<compile_context>
chip_gen: v7x
topology: tpu7x:2x2x1
jax: 0.10.0
libtpu: 0.0.40
codegen_flags: <defaults>
</compile_context>

<pallas_src>
import math

import jax
import jax.numpy as jnp
from jax.experimental import pallas as pl
from jax.experimental.pallas import tpu as pltpu


# ----------------------------------------------------------------------------
# Small helpers
# ----------------------------------------------------------------------------
def _pick_tile(n, cap, mult):
    """Largest divisor of n that is <= cap and a multiple of `mult`.

    Returns n itself when n <= cap (full-extent block is always layout-legal)
    or when no such divisor exists.
    """
    if n <= cap:
        return n
    start = cap - (cap % mult)
    for t in range(start, 0, -mult):
        if n % t == 0:
            return t
    return n


def _erf(z):
    # float32 erf (Abramowitz & Stegun 7.1.26, |err| < 1.5e-7), built from ops
    # that lower cleanly in Mosaic (exp / abs / where), so exact-GELU stays
    # entirely inside the kernel.
    a1, a2, a3, a4, a5 = 0.254829592, -0.284496736, 1.421413741, -1.453152027, 1.061405429
    p = 0.3275911
    s = jnp.where(z >= 0.0, 1.0, -1.0)
    az = jnp.abs(z)
    t = 1.0 / (1.0 + p * az)
    poly = ((((a5 * t + a4) * t + a3) * t + a2) * t + a1) * t
    return s * (1.0 - poly * jnp.exp(-az * az))


def _gelu_exact(z):
    # matches torch.nn.GELU() (approximate='none'): 0.5*x*(1+erf(x/sqrt(2)))
    return 0.5 * z * (1.0 + _erf(z * (1.0 / math.sqrt(2.0))))


# ----------------------------------------------------------------------------
# Pallas kernels
# ----------------------------------------------------------------------------
def _spectral_kernel(xr_ref, xi_ref, er_ref, ei_ref, wr_ref, wi_ref, or_ref, oi_ref):
    # Lane-dense blocks:
    #   xr/xi: (B, ci_t, P)   er/ei: (B, 1, P)
    #   wr/wi: (ci_t, co_t, P)        out r/i: (B, co_t, P)  (resident over ci)
    # Implements  out[b,o,p] = sum_i (x[b,i,p] * e[b,p]) * w[i,o,p]  (complex).
    ci_t = xr_ref.shape[1]

    xr = xr_ref[...]
    xi = xi_ref[...]
    er = er_ref[...]                       # (B, 1, P) -> broadcast over Ci
    ei = ei_ref[...]

    # complex multiply by the per-batch frequency embedding
    ar = xr * er - xi * ei                 # (B, ci_t, P)
    ai = xr * ei + xi * er

    acc_r = jnp.zeros(or_ref.shape, jnp.float32)
    acc_i = jnp.zeros(oi_ref.shape, jnp.float32)
    for i in range(ci_t):                  # static unroll, bounded by the Ci tile
        wr_i = wr_ref[i][None]             # (1, co_t, P)
        wi_i = wi_ref[i][None]
        ar_i = ar[:, i:i + 1, :]           # (B, 1, P)
        ai_i = ai[:, i:i + 1, :]
        acc_r = acc_r + (ar_i * wr_i - ai_i * wi_i)
        acc_i = acc_i + (ar_i * wi_i + ai_i * wr_i)

    ci_idx = pl.program_id(1)

    @pl.when(ci_idx == 0)
    def _():
        or_ref[...] = acc_r
        oi_ref[...] = acc_i

    @pl.when(ci_idx > 0)
    def _():
        or_ref[...] += acc_r
        oi_ref[...] += acc_i


def _conv1x1_add_gelu_kernel(x1_ref, x_ref, w_ref, b_ref, e_ref, o_ref):
    # x1: (B, Co, hw_t) fourier branch,  x: (B, Ci, hw_t),  w: (Co, Ci),
    # b: (Co, 1),  e: (B, Co, 1) conditioning (zeros when unused).
    # Output lane axis = hw_t (lane-dense stores).
    w = w_ref[...]
    bias = b_ref[...]
    for bb in range(x_ref.shape[0]):       # static unroll over (small) batch
        conv = jnp.dot(w, x_ref[bb], preferred_element_type=jnp.float32)  # (Co, hw_t)
        z = x1_ref[bb] + conv + bias + e_ref[bb]
        o_ref[bb] = _gelu_exact(z)


# ----------------------------------------------------------------------------
# Wrappers (glue: FFTs, slicing, reshapes)
# ----------------------------------------------------------------------------
def spectral_conv2d_cond(x, emb, wr, wi, fl_w, fl_b, m1, m2):
    """SpectralConv2d_cond.forward (with conditioning emb).

    wr/wi: pre-flattened real/imag spectral weights of shape (Ci, Co, 2*m1*m2)
    fl_w/fl_b: FreqLinear weights pre-permuted to emit [er | ei] directly.
    """
    B, Ci, H, W = x.shape
    Co = wr.shape[1]
    P = 2 * m1 * m2
    assert 2 * m1 <= H, "mode corners must not overlap (2*modes1 <= H)"
    assert m2 <= W // 2 + 1, "modes2 must fit the rfft width"

    # FreqLinear in plain XLA (micro-matmul, fuses with the FFT glue).
    h = emb @ fl_w + fl_b                                # (B, 2*P), fast layout
    er = h[:, :P].reshape(B, 1, P)
    ei = h[:, P:].reshape(B, 1, P)

    # TODO(synk): rfft2/irfft2 have no Pallas TPU primitive; done in plain JAX.
    x_ft = jnp.fft.rfft2(x)                              # (B, Ci, H, Wf) complex64
    Wf = x_ft.shape[-1]
    corners = jnp.concatenate(
        [x_ft[:, :, :m1, :m2], x_ft[:, :, H - m1:, :m2]], axis=2)  # (B,Ci,2*m1,m2)
    xr = jnp.real(corners).reshape(B, Ci, P)
    xi = jnp.imag(corners).reshape(B, Ci, P)

    co_t = _pick_tile(Co, 128, 8)
    ci_t = _pick_tile(Ci, 32, 8)
    grid = (Co // co_t, Ci // ci_t)

    flops = B * P * Ci * (6 + 8 * Co)
    bytes_acc = 4 * (2 * B * Ci * P + 2 * B * P + 2 * Ci * Co * P + 2 * B * Co * P)

    out_r, out_i = pl.pallas_call(
        _spectral_kernel,
        grid=grid,
        in_specs=[
            pl.BlockSpec((B, ci_t, P), lambda co, ci: (0, ci, 0)),
            pl.BlockSpec((B, ci_t, P), lambda co, ci: (0, ci, 0)),
            pl.BlockSpec((B, 1, P), lambda co, ci: (0, 0, 0)),
            pl.BlockSpec((B, 1, P), lambda co, ci: (0, 0, 0)),
            pl.BlockSpec((ci_t, co_t, P), lambda co, ci: (ci, co, 0)),
            pl.BlockSpec((ci_t, co_t, P), lambda co, ci: (ci, co, 0)),
        ],
        out_specs=[
            pl.BlockSpec((B, co_t, P), lambda co, ci: (0, co, 0)),
            pl.BlockSpec((B, co_t, P), lambda co, ci: (0, co, 0)),
        ],
        out_shape=[
            jax.ShapeDtypeStruct((B, Co, P), jnp.float32),
            jax.ShapeDtypeStruct((B, Co, P), jnp.float32),
        ],
        compiler_params=pltpu.CompilerParams(
            dimension_semantics=("parallel", "arbitrary")),
        cost_estimate=pl.CostEstimate(
            flops=int(flops), transcendentals=0, bytes_accessed=int(bytes_acc)),
    )(xr, xi, er, ei, wr, wi)

    out_c = jax.lax.complex(out_r, out_i).reshape(B, Co, 2 * m1, m2)
    out_ft = jnp.zeros((B, Co, H, Wf), dtype=jnp.complex64)
    out_ft = out_ft.at[:, :, :m1, :m2].set(out_c[:, :, :m1])
    out_ft = out_ft.at[:, :, H - m1:, :m2].set(out_c[:, :, m1:])
    return jnp.fft.irfft2(out_ft, s=(H, W))              # (B, Co, H, W)


def _conv1x1_add_gelu(x1, x, w, b, e):
    """GELU(x1 + Conv1x1(x) + e), e broadcast over spatial dims."""
    B, Ci, H, W = x.shape
    Co = w.shape[0]
    HW = H * W
    hw_t = _pick_tile(HW, 4096, 128)

    x1f = x1.reshape(B, Co, HW)
    xf = x.reshape(B, Ci, HW)

    flops = 2 * B * Co * Ci * HW + 12 * B * Co * HW
    bytes_acc = 4 * (2 * B * Co * HW + B * Ci * HW + Co * Ci + Co + B * Co)

    out = pl.pallas_call(
        _conv1x1_add_gelu_kernel,
        grid=(HW // hw_t,),
        in_specs=[
            pl.BlockSpec((B, Co, hw_t), lambda hh: (0, 0, hh)),
            pl.BlockSpec((B, Ci, hw_t), lambda hh: (0, 0, hh)),
            pl.BlockSpec((Co, Ci), lambda hh: (0, 0)),
            pl.BlockSpec((Co, 1), lambda hh: (0, 0)),
            pl.BlockSpec((B, Co, 1), lambda hh: (0, 0, 0)),
        ],
        out_specs=pl.BlockSpec((B, Co, hw_t), lambda hh: (0, 0, hh)),
        out_shape=jax.ShapeDtypeStruct((B, Co, HW), jnp.float32),
        compiler_params=pltpu.CompilerParams(dimension_semantics=("parallel",)),
        input_output_aliases={0: 0},       # fourier branch buffer reused as output
        cost_estimate=pl.CostEstimate(
            flops=int(flops), transcendentals=int(B * Co * HW),
            bytes_accessed=int(bytes_acc)),
    )(x1f, xf, w, b, e)
    return out.reshape(B, Co, H, W)


def fourier_basic_block(x, emb, p, m1, m2):
    """FourierBasicBlock.forward(x, emb)."""
    B = x.shape[0]
    planes = p["conv1_w"].shape[0]

    # --- block 1: GELU(fourier1(x, emb) + conv1(x) + cond_emb(emb)) ---
    x1 = spectral_conv2d_cond(
        x, emb, p["f1_wr"], p["f1_wi"], p["f1_fl_w"], p["f1_fl_b"], m1, m2)
    emb_out = (emb @ p["ce_w"] + p["ce_b"]).reshape(B, planes, 1)
    out = _conv1x1_add_gelu(x1, x, p["conv1_w"], p["conv1_b"], emb_out)

    # --- block 2: GELU(fourier2(out, emb) + conv2(out)) ---
    x1b = spectral_conv2d_cond(
        out, emb, p["f2_wr"], p["f2_wi"], p["f2_fl_w"], p["f2_fl_b"], m1, m2)
    zero_e = jnp.zeros((B, planes, 1), jnp.float32)
    out = _conv1x1_add_gelu(x1b, out, p["conv2_w"], p["conv2_b"], zero_e)
    return out


# ----------------------------------------------------------------------------
# Deterministic synthetic parameters (shapes follow the PyTorch __init__),
# pre-processed once into the kernel-friendly layouts.
# ----------------------------------------------------------------------------
def _freq_linear_fast_layout(w, b, m1, m2):
    """Permute FreqLinear params so `emb @ w + b` directly yields [er | ei],
    each of length P = 2*m1*m2 in the kernel's corner-flattened order.

    Torch layout: output column c maps to (x, y, corner, re/im) with
    c = ((x*m2 + y)*2 + corner)*2 + ri  (from the (B,m1,m2,2,2) reshape).
    """
    x = jnp.arange(m1)[:, None, None]
    y = jnp.arange(m2)[None, :, None]
    k = jnp.arange(2)[None, None, :]                 # corner index
    old_r = ((x * m2 + y) * 2 + k) * 2               # ri = 0 columns, (m1,m2,2)
    order_r = jnp.transpose(old_r, (2, 0, 1)).reshape(-1)   # corner-major flatten
    perm = jnp.concatenate([order_r, order_r + 1])   # [er cols | ei cols]
    return w[:, perm], b[:, perm]


def init_params(key, in_planes, planes, cond_channels, m1, m2):
    ks = jax.random.split(key, 12)
    P = 2 * m1 * m2

    def spectral_w(k, ci, co):
        # weights1 / weights2 generated separately (as in torch), then
        # concatenated along the modes1 axis and lane-flattened ONCE here.
        scale = 1.0 / (ci * co)
        k1, k2, k3, k4 = jax.random.split(k, 4)
        w1r = scale * jax.random.uniform(k1, (ci, co, m1, m2), jnp.float32)
        w1i = scale * jax.random.uniform(k2, (ci, co, m1, m2), jnp.float32)
        w2r = scale * jax.random.uniform(k3, (ci, co, m1, m2), jnp.float32)
        w2i = scale * jax.random.uniform(k4, (ci, co, m1, m2), jnp.float32)
        wr = jnp.concatenate([w1r, w2r], axis=2).reshape(ci, co, P)
        wi = jnp.concatenate([w1i, w2i], axis=2).reshape(ci, co, P)
        return wr, wi

    def freq_linear(k, cc):
        scale = 1.0 / (cc + 4 * m1 * m2)
        w = scale * jax.random.normal(k, (cc, 4 * m1 * m2), jnp.float32)
        b = jnp.zeros((1, 4 * m1 * m2), jnp.float32)
        return _freq_linear_fast_layout(w, b, m1, m2)

    p = {}
    p["f1_wr"], p["f1_wi"] = spectral_w(ks[0], in_planes, planes)
    p["f1_fl_w"], p["f1_fl_b"] = freq_linear(ks[2], cond_channels)
    p["f2_wr"], p["f2_wi"] = spectral_w(ks[3], planes, planes)
    p["f2_fl_w"], p["f2_fl_b"] = freq_linear(ks[5], cond_channels)
    p["conv1_w"] = 0.1 * jax.random.normal(ks[6], (planes, in_planes), jnp.float32)
    p["conv1_b"] = 0.1 * jax.random.normal(ks[7], (planes, 1), jnp.float32)
    p["conv2_w"] = 0.1 * jax.random.normal(ks[8], (planes, planes), jnp.float32)
    p["conv2_b"] = 0.1 * jax.random.normal(ks[9], (planes, 1), jnp.float32)
    p["ce_w"] = 0.1 * jax.random.normal(ks[10], (cond_channels, planes), jnp.float32)
    p["ce_b"] = jnp.zeros((1, planes), jnp.float32)
    return p


if __name__ == "__main__":
    B, in_planes, planes, cond_channels = 2, 4, 8, 3
    H = W = 16
    m1 = m2 = 4   # modes small enough that the two mode corners don't overlap

    key = jax.random.PRNGKey(0)
    kx, ke, kp = jax.random.split(key, 3)
    x = jax.random.normal(kx, (B, in_planes, H, W), jnp.float32)
    emb = jax.random.normal(ke, (B, cond_channels), jnp.float32)
    params = init_params(kp, in_planes, planes, cond_channels, m1, m2)

    out = fourier_basic_block(x, emb, params, m1, m2)
    out = jax.block_until_ready(out)
    assert out.shape == (B, planes, H, W)
    assert bool(jnp.all(jnp.isfinite(out)))
    print("KERNEL_OK")
</pallas_src>

<mosaic_0001>
module attributes {stable_mosaic.version = 11 : i64} {
  func.func @_spectral_kernel(%arg0: i32, %arg1: i32, %arg2: memref<2x4x32xf32, #tpu.memory_space<vmem>>, %arg3: memref<2x4x32xf32, #tpu.memory_space<vmem>>, %arg4: memref<2x1x32xf32, #tpu.memory_space<vmem>>, %arg5: memref<2x1x32xf32, #tpu.memory_space<vmem>>, %arg6: memref<4x8x32xf32, #tpu.memory_space<vmem>>, %arg7: memref<4x8x32xf32, #tpu.memory_space<vmem>>, %arg8: memref<2x8x32xf32, #tpu.memory_space<vmem>>, %arg9: memref<2x8x32xf32, #tpu.memory_space<vmem>>) attributes {dimension_semantics = [#tpu.dimension_semantics<parallel>, #tpu.dimension_semantics<arbitrary>], iteration_bounds = array<i64: 1, 1>, scalar_prefetch = 0 : i64, scratch_operands = 0 : i64, tpu.core_type = #tpu.core_type<tc>, window_params = [{transform_indices = @transform_0, window_bounds = array<i64: 2, 4, 32>}, {transform_indices = @transform_1, window_bounds = array<i64: 2, 4, 32>}, {pipeline_mode = #tpu.pipeline_mode<synchronous>, transform_indices = @transform_2, window_bounds = array<i64: 2, 1, 32>}, {pipeline_mode = #tpu.pipeline_mode<synchronous>, transform_indices = @transform_3, window_bounds = array<i64: 2, 1, 32>}, {transform_indices = @transform_4, window_bounds = array<i64: 4, 8, 32>}, {transform_indices = @transform_5, window_bounds = array<i64: 4, 8, 32>}, {transform_indices = @transform_6, window_bounds = array<i64: 2, 8, 32>}, {transform_indices = @transform_7, window_bounds = array<i64: 2, 8, 32>}]} {
    %c0 = arith.constant 0 : index
    %c0_0 = arith.constant 0 : index
    %c0_1 = arith.constant 0 : index
    %0 = vector.load %arg2[%c0, %c0_0, %c0_1] : memref<2x4x32xf32, #tpu.memory_space<vmem>>, vector<2x4x32xf32>
    %c0_2 = arith.constant 0 : index
    %c0_3 = arith.constant 0 : index
    %c0_4 = arith.constant 0 : index
    %1 = vector.load %arg3[%c0_2, %c0_3, %c0_4] : memref<2x4x32xf32, #tpu.memory_space<vmem>>, vector<2x4x32xf32>
    %c0_5 = arith.constant 0 : index
    %c0_6 = arith.constant 0 : index
    %c0_7 = arith.constant 0 : index
    %2 = vector.load %arg4[%c0_5, %c0_6, %c0_7] : memref<2x1x32xf32, #tpu.memory_space<vmem>>, vector<2x1x32xf32>
    %c0_8 = arith.constant 0 : index
    %c0_9 = arith.constant 0 : index
    %c0_10 = arith.constant 0 : index
    %3 = vector.load %arg5[%c0_8, %c0_9, %c0_10] : memref<2x1x32xf32, #tpu.memory_space<vmem>>, vector<2x1x32xf32>
    %4 = vector.broadcast %2 : vector<2x1x32xf32> to vector<2x4x32xf32>
    %5 = arith.mulf %0, %4 : vector<2x4x32xf32>
    %6 = vector.broadcast %3 : vector<2x1x32xf32> to vector<2x4x32xf32>
    %7 = arith.mulf %1, %6 : vector<2x4x32xf32>
    %8 = arith.subf %5, %7 : vector<2x4x32xf32>
    %9 = vector.broadcast %3 : vector<2x1x32xf32> to vector<2x4x32xf32>
    %10 = arith.mulf %0, %9 : vector<2x4x32xf32>
    %11 = vector.broadcast %2 : vector<2x1x32xf32> to vector<2x4x32xf32>
    %12 = arith.mulf %1, %11 : vector<2x4x32xf32>
    %13 = arith.addf %10, %12 : vector<2x4x32xf32>
    %cst = arith.constant 0.000000e+00 : f32
    %14 = vector.broadcast %cst : f32 to vector<2x8x32xf32>
    %cst_11 = arith.constant 0.000000e+00 : f32
    %15 = vector.broadcast %cst_11 : f32 to vector<2x8x32xf32>
    %c0_12 = arith.constant 0 : index
    %c0_13 = arith.constant 0 : index
    %c0_14 = arith.constant 0 : index
    %16 = vector.load %arg6[%c0_12, %c0_13, %c0_14] : memref<4x8x32xf32, #tpu.memory_space<vmem>>, vector<1x8x32xf32>
    %17 = vector.shape_cast %16 : vector<1x8x32xf32> to vector<8x32xf32>
    %18 = vector.shape_cast %17 : vector<8x32xf32> to vector<1x8x32xf32>
    %c0_15 = arith.constant 0 : index
    %c0_16 = arith.constant 0 : index
    %c0_17 = arith.constant 0 : index
    %19 = vector.load %arg7[%c0_15, %c0_16, %c0_17] : memref<4x8x32xf32, #tpu.memory_space<vmem>>, vector<1x8x32xf32>
    %20 = vector.shape_cast %19 : vector<1x8x32xf32> to vector<8x32xf32>
    %21 = vector.shape_cast %20 : vector<8x32xf32> to vector<1x8x32xf32>
    %22 = vector.extract_strided_slice %8 {offsets = [0, 0, 0], sizes = [2, 1, 32], strides = [1, 1, 1]} : vector<2x4x32xf32> to vector<2x1x32xf32>
    %23 = vector.extract_strided_slice %13 {offsets = [0, 0, 0], sizes = [2, 1, 32], strides = [1, 1, 1]} : vector<2x4x32xf32> to vector<2x1x32xf32>
    %24 = vector.broadcast %22 : vector<2x1x32xf32> to vector<2x8x32xf32>
    %25 = vector.broadcast %18 : vector<1x8x32xf32> to vector<2x8x32xf32>
    %26 = arith.mulf %24, %25 : vector<2x8x32xf32>
    %27 = vector.broadcast %23 : vector<2x1x32xf32> to vector<2x8x32xf32>
    %28 = vector.broadcast %21 : vector<1x8x32xf32> to vector<2x8x32xf32>
    %29 = arith.mulf %27, %28 : vector<2x8x32xf32>
    %30 = arith.subf %26, %29 : vector<2x8x32xf32>
    %31 = arith.addf %14, %30 : vector<2x8x32xf32>
    %32 = vector.broadcast %22 : vector<2x1x32xf32> to vector<2x8x32xf32>
    %33 = vector.broadcast %21 : vector<1x8x32xf32> to vector<2x8x32xf32>
    %34 = arith.mulf %32, %33 : vector<2x8x32xf32>
    %35 = vector.broadcast %23 : vector<2x1x32xf32> to vector<2x8x32xf32>
    %36 = vector.broadcast %18 : vector<1x8x32xf32> to vector<2x8x32xf32>
    %37 = arith.mulf %35, %36 : vector<2x8x32xf32>
    %38 = arith.addf %34, %37 : vector<2x8x32xf32>
    %39 = arith.addf %15, %38 : vector<2x8x32xf32>
    %c1 = arith.constant 1 : index
    %c0_18 = arith.constant 0 : index
    %c0_19 = arith.constant 0 : index
    %40 = vector.load %arg6[%c1, %c0_18, %c0_19] : memref<4x8x32xf32, #tpu.memory_space<vmem>>, vector<1x8x32xf32>
    %41 = vector.shape_cast %40 : vector<1x8x32xf32> to vector<8x32xf32>
    %42 = vector.shape_cast %41 : vector<8x32xf32> to vector<1x8x32xf32>
    %c1_20 = arith.constant 1 : index
    %c0_21 = arith.constant 0 : index
    %c0_22 = arith.constant 0 : index
    %43 = vector.load %arg7[%c1_20, %c0_21, %c0_22] : memref<4x8x32xf32, #tpu.memory_space<vmem>>, vector<1x8x32xf32>
    %44 = vector.shape_cast %43 : vector<1x8x32xf32> to vector<8x32xf32>
    %45 = vector.shape_cast %44 : vector<8x32xf32> to vector<1x8x32xf32>
    %46 = vector.extract_strided_slice %8 {offsets = [0, 1, 0], sizes = [2, 1, 32], strides = [1, 1, 1]} : vector<2x4x32xf32> to vector<2x1x32xf32>
    %47 = vector.extract_strided_slice %13 {offsets = [0, 1, 0], sizes = [2, 1, 32], strides = [1, 1, 1]} : vector<2x4x32xf32> to vector<2x1x32xf32>
    %48 = vector.broadcast %46 : vector<2x1x32xf32> to vector<2x8x32xf32>
    %49 = vector.broadcast %42 : vector<1x8x32xf32> to vector<2x8x32xf32>
    %50 = arith.mulf %48, %49 : vector<2x8x32xf32>
    %51 = vector.broadcast %47 : vector<2x1x32xf32> to vector<2x8x32xf32>
    %52 = vector.broadcast %45 : vector<1x8x32xf32> to vector<2x8x32xf32>
    %53 = arith.mulf %51, %52 : vector<2x8x32xf32>
    %54 = arith.subf %50, %53 : vector<2x8x32xf32>
    %55 = arith.addf %31, %54 : vector<2x8x32xf32>
    %56 = vector.broadcast %46 : vector<2x1x32xf32> to vector<2x8x32xf32>
    %57 = vector.broadcast %45 : vector<1x8x32xf32> to vector<2x8x32xf32>
    %58 = arith.mulf %56, %57 : vector<2x8x32xf32>
    %59 = vector.broadcast %47 : vector<2x1x32xf32> to vector<2x8x32xf32>
    %60 = vector.broadcast %42 : vector<1x8x32xf32> to vector<2x8x32xf32>
    %61 = arith.mulf %59, %60 : vector<2x8x32xf32>
    %62 = arith.addf %58, %61 : vector<2x8x32xf32>
    %63 = arith.addf %39, %62 : vector<2x8x32xf32>
    %c2 = arith.constant 2 : index
    %c0_23 = arith.constant 0 : index
    %c0_24 = arith.constant 0 : index
    %64 = vector.load %arg6[%c2, %c0_23, %c0_24] : memref<4x8x32xf32, #tpu.memory_space<vmem>>, vector<1x8x32xf32>
    %65 = vector.shape_cast %64 : vector<1x8x32xf32> to vector<8x32xf32>
    %66 = vector.shape_cast %65 : vector<8x32xf32> to vector<1x8x32xf32>
    %c2_25 = arith.constant 2 : index
    %c0_26 = arith.constant 0 : index
    %c0_27 = arith.constant 0 : index
    %67 = vector.load %arg7[%c2_25, %c0_26, %c0_27] : memref<4x8x32xf32, #tpu.memory_space<vmem>>, vector<1x8x32xf32>
    %68 = vector.shape_cast %67 : vector<1x8x32xf32> to vector<8x32xf32>
    %69 = vector.shape_cast %68 : vector<8x32xf32> to vector<1x8x32xf32>
    %70 = vector.extract_strided_slice %8 {offsets = [0, 2, 0], sizes = [2, 1, 32], strides = [1, 1, 1]} : vector<2x4x32xf32> to vector<2x1x32xf32>
    %71 = vector.extract_strided_slice %13 {offsets = [0, 2, 0], sizes = [2, 1, 32], strides = [1, 1, 1]} : vector<2x4x32xf32> to vector<2x1x32xf32>
    %72 = vector.broadcast %70 : vector<2x1x32xf32> to vector<2x8x32xf32>
    %73 = vector.broadcast %66 : vector<1x8x32xf32> to vector<2x8x32xf32>
    %74 = arith.mulf %72, %73 : vector<2x8x32xf32>
    %75 = vector.broadcast %71 : vector<2x1x32xf32> to vector<2x8x32xf32>
    %76 = vector.broadcast %69 : vector<1x8x32xf32> to vector<2x8x32xf32>
    %77 = arith.mulf %75, %76 : vector<2x8x32xf32>
    %78 = arith.subf %74, %77 : vector<2x8x32xf32>
    %79 = arith.addf %55, %78 : vector<2x8x32xf32>
    %80 = vector.broadcast %70 : vector<2x1x32xf32> to vector<2x8x32xf32>
    %81 = vector.broadcast %69 : vector<1x8x32xf32> to vector<2x8x32xf32>
    %82 = arith.mulf %80, %81 : vector<2x8x32xf32>
    %83 = vector.broadcast %71 : vector<2x1x32xf32> to vector<2x8x32xf32>
    %84 = vector.broadcast %66 : vector<1x8x32xf32> to vector<2x8x32xf32>
    %85 = arith.mulf %83, %84 : vector<2x8x32xf32>
    %86 = arith.addf %82, %85 : vector<2x8x32xf32>
    %87 = arith.addf %63, %86 : vector<2x8x32xf32>
    %c3 = arith.constant 3 : index
    %c0_28 = arith.constant 0 : index
    %c0_29 = arith.constant 0 : index
    %88 = vector.load %arg6[%c3, %c0_28, %c0_29] : memref<4x8x32xf32, #tpu.memory_space<vmem>>, vector<1x8x32xf32>
    %89 = vector.shape_cast %88 : vector<1x8x32xf32> to vector<8x32xf32>
    %90 = vector.shape_cast %89 : vector<8x32xf32> to vector<1x8x32xf32>
    %c3_30 = arith.constant 3 : index
    %c0_31 = arith.constant 0 : index
    %c0_32 = arith.constant 0 : index
    %91 = vector.load %arg7[%c3_30, %c0_31, %c0_32] : memref<4x8x32xf32, #tpu.memory_space<vmem>>, vector<1x8x32xf32>
    %92 = vector.shape_cast %91 : vector<1x8x32xf32> to vector<8x32xf32>
    %93 = vector.shape_cast %92 : vector<8x32xf32> to vector<1x8x32xf32>
    %94 = vector.extract_strided_slice %8 {offsets = [0, 3, 0], sizes = [2, 1, 32], strides = [1, 1, 1]} : vector<2x4x32xf32> to vector<2x1x32xf32>
    %95 = vector.extract_strided_slice %13 {offsets = [0, 3, 0], sizes = [2, 1, 32], strides = [1, 1, 1]} : vector<2x4x32xf32> to vector<2x1x32xf32>
    %96 = vector.broadcast %94 : vector<2x1x32xf32> to vector<2x8x32xf32>
    %97 = vector.broadcast %90 : vector<1x8x32xf32> to vector<2x8x32xf32>
    %98 = arith.mulf %96, %97 : vector<2x8x32xf32>
    %99 = vector.broadcast %95 : vector<2x1x32xf32> to vector<2x8x32xf32>
    %100 = vector.broadcast %93 : vector<1x8x32xf32> to vector<2x8x32xf32>
    %101 = arith.mulf %99, %100 : vector<2x8x32xf32>
    %102 = arith.subf %98, %101 : vector<2x8x32xf32>
    %103 = arith.addf %79, %102 : vector<2x8x32xf32>
    %104 = vector.broadcast %94 : vector<2x1x32xf32> to vector<2x8x32xf32>
    %105 = vector.broadcast %93 : vector<1x8x32xf32> to vector<2x8x32xf32>
    %106 = arith.mulf %104, %105 : vector<2x8x32xf32>
    %107 = vector.broadcast %95 : vector<2x1x32xf32> to vector<2x8x32xf32>
    %108 = vector.broadcast %90 : vector<1x8x32xf32> to vector<2x8x32xf32>
    %109 = arith.mulf %107, %108 : vector<2x8x32xf32>
    %110 = arith.addf %106, %109 : vector<2x8x32xf32>
    %111 = arith.addf %87, %110 : vector<2x8x32xf32>
    %c0_i32 = arith.constant 0 : i32
    %112 = arith.cmpi eq, %arg1, %c0_i32 : i32
    %113 = arith.extui %112 : i1 to i32
    %c0_i32_33 = arith.constant 0 : i32
    %114 = arith.cmpi ne, %113, %c0_i32_33 : i32
    scf.if %114 {
      %c0_36 = arith.constant 0 : index
      %c0_37 = arith.constant 0 : index
      %c0_38 = arith.constant 0 : index
      %118 = vector.load %arg8[%c0_36, %c0_37, %c0_38] : memref<2x8x32xf32, #tpu.memory_space<vmem>>, vector<2x8x32xf32>
      tpu.vector_store %arg8[%c0_36, %c0_37, %c0_38], %103 {strides = array<i32>} : memref<2x8x32xf32, #tpu.memory_space<vmem>>, vector<2x8x32xf32>,
      %c0_39 = arith.constant 0 : index
      %c0_40 = arith.constant 0 : index
      %c0_41 = arith.constant 0 : index
      %119 = vector.load %arg9[%c0_39, %c0_40, %c0_41] : memref<2x8x32xf32, #tpu.memory_space<vmem>>, vector<2x8x32xf32>
      tpu.vector_store %arg9[%c0_39, %c0_40, %c0_41], %111 {strides = array<i32>} : memref<2x8x32xf32, #tpu.memory_space<vmem>>, vector<2x8x32xf32>,
    } else {
    }
    %c0_i32_34 = arith.constant 0 : i32
    %115 = arith.cmpi sgt, %arg1, %c0_i32_34 : i32
    %116 = arith.extui %115 : i1 to i32
    %c0_i32_35 = arith.constant 0 : i32
    %117 = arith.cmpi ne, %116, %c0_i32_35 : i32
    scf.if %117 {
      %c0_36 = arith.constant 0 : index
      %c0_37 = arith.constant 0 : index
      %c0_38 = arith.constant 0 : index
      %118 = vector.load %arg8[%c0_36, %c0_37, %c0_38] : memref<2x8x32xf32, #tpu.memory_space<vmem>>, vector<2x8x32xf32>
      %119 = arith.addf %118, %103 : vector<2x8x32xf32>
      %c0_39 = arith.constant 0 : index
      %c0_40 = arith.constant 0 : index
      %c0_41 = arith.constant 0 : index
      %120 = vector.load %arg8[%c0_39, %c0_40, %c0_41] : memref<2x8x32xf32, #tpu.memory_space<vmem>>, vector<2x8x32xf32>
      tpu.vector_store %arg8[%c0_39, %c0_40, %c0_41], %119 {strides = array<i32>} : memref<2x8x32xf32, #tpu.memory_space<vmem>>, vector<2x8x32xf32>,
      %c0_42 = arith.constant 0 : index
      %c0_43 = arith.constant 0 : index
      %c0_44 = arith.constant 0 : index
      %121 = vector.load %arg9[%c0_42, %c0_43, %c0_44] : memref<2x8x32xf32, #tpu.memory_space<vmem>>, vector<2x8x32xf32>
      %122 = arith.addf %121, %111 : vector<2x8x32xf32>
      %c0_45 = arith.constant 0 : index
      %c0_46 = arith.constant 0 : index
      %c0_47 = arith.constant 0 : index
      %123 = vector.load %arg9[%c0_45, %c0_46, %c0_47] : memref<2x8x32xf32, #tpu.memory_space<vmem>>, vector<2x8x32xf32>
      tpu.vector_store %arg9[%c0_45, %c0_46, %c0_47], %122 {strides = array<i32>} : memref<2x8x32xf32, #tpu.memory_space<vmem>>, vector<2x8x32xf32>,
    } else {
    }
    return
  }
  func.func @transform_0(%arg0: i32, %arg1: i32) -> (i32, i32, i32) {
    %c0_i32 = arith.constant 0 : i32
    %c0_i32_0 = arith.constant 0 : i32
    %c0_i32_1 = arith.constant 0 : i32
    return %c0_i32, %arg1, %c0_i32_0 : i32, i32, i32
  }
  func.func @transform_1(%arg0: i32, %arg1: i32) -> (i32, i32, i32) {
    %c0_i32 = arith.constant 0 : i32
    %c0_i32_0 = arith.constant 0 : i32
    %c0_i32_1 = arith.constant 0 : i32
    return %c0_i32, %arg1, %c0_i32_0 : i32, i32, i32
  }
  func.func @transform_2(%arg0: i32, %arg1: i32) -> (i32, i32, i32) {
    %c0_i32 = arith.constant 0 : i32
    %c0_i32_0 = arith.constant 0 : i32
    %c0_i32_1 = arith.constant 0 : i32
    %c0_i32_2 = arith.constant 0 : i32
    return %c0_i32, %c0_i32_0, %c0_i32_1 : i32, i32, i32
  }
  func.func @transform_3(%arg0: i32, %arg1: i32) -> (i32, i32, i32) {
    %c0_i32 = arith.constant 0 : i32
    %c0_i32_0 = arith.constant 0 : i32
    %c0_i32_1 = arith.constant 0 : i32
    %c0_i32_2 = arith.constant 0 : i32
    return %c0_i32, %c0_i32_0, %c0_i32_1 : i32, i32, i32
  }
  func.func @transform_4(%arg0: i32, %arg1: i32) -> (i32, i32, i32) {
    %c0_i32 = arith.constant 0 : i32
    %c0_i32_0 = arith.constant 0 : i32
    return %arg1, %arg0, %c0_i32 : i32, i32, i32
  }
  func.func @transform_5(%arg0: i32, %arg1: i32) -> (i32, i32, i32) {
    %c0_i32 = arith.constant 0 : i32
    %c0_i32_0 = arith.constant 0 : i32
    return %arg1, %arg0, %c0_i32 : i32, i32, i32
  }
  func.func @transform_6(%arg0: i32, %arg1: i32) -> (i32, i32, i32) {
    %c0_i32 = arith.constant 0 : i32
    %c0_i32_0 = arith.constant 0 : i32
    %c0_i32_1 = arith.constant 0 : i32
    return %c0_i32, %arg0, %c0_i32_0 : i32, i32, i32
  }
  func.func @transform_7(%arg0: i32, %arg1: i32) -> (i32, i32, i32) {
    %c0_i32 = arith.constant 0 : i32
    %c0_i32_0 = arith.constant 0 : i32
    %c0_i32_1 = arith.constant 0 : i32
    return %c0_i32, %arg0, %c0_i32_0 : i32, i32, i32
  }
}

</mosaic_0001>

<bundles_post_ra>
// kernel: tpu_custom_call.1
= control target key start
LH: loop header
LB: loop body
LE: loop exit
PB: predicated region body
PF: predicated region fallthrough
CT: control target
= control target key end

     0   :  { %13 = vsyncpa [#allocation3], 0  ;;  %s696_s0 = inlined_call_operand.hbm [shape: f32[2,4,32], index: 0, kind: input, shape index: {}]   ;;  %s697_s1 = inlined_call_operand.hbm [shape: f32[2,4,32], index: 1, kind: input, shape index: {}]   ;;  %s698_s2 = inlined_call_operand.vmem [shape: f32[2,1,32], index: 2, kind: input, shape index: {}]   ;;  %s699_s3 = inlined_call_operand.vmem [shape: f32[2,1,32], index: 3, kind: input, shape index: {}]   ;;  %s700_s4 = inlined_call_operand.hbm [shape: f32[4,8,32], index: 4, kind: input, shape index: {}]   ;;  %s701_s5 = inlined_call_operand.hbm [shape: f32[4,8,32], index: 5, kind: input, shape index: {}]   ;;  %s702_s6 = inlined_call_operand.hbm [shape: f32[2,8,32], index: 6, kind: output, shape index: {0}]   ;;  %s703_s7 = inlined_call_operand.hbm [shape: f32[2,8,32], index: 7, kind: output, shape index: {1}]  }
   0x1   :  { %14 = vsyncpa [#allocation6], 0 }
   0x2   :  { %15 = vsyncpa [#allocation9], 0 }
   0x3   :  { %16 = vsyncpa [#allocation4], 0 }
   0x4   :  { %17 = vsyncpa [#allocation12], 0  ;;  %s485_s24 = smov [#allocation5]   ;;  %s486_s26 = smov [#allocation2]  }
   0x5   :  { %s35_s25 = sshll.u32 %s485_s24, 4  ;;  %s23_s27 = sshll.u32 %s486_s26, 4  ;;  %s36_s25 = int_to_ptr.vmem [resolvable:$true] %s35_s25  ;;  %s535_s27 = int_to_ptr.vmem [resolvable:$true] %s23_s27 }
   0x6   :  { %s343_s30 = scalar_lea.hbm %s697_s1, 128 }
   0x7   :  { %p344_p0 = scmp.ne.s32.totalorder %s697_s1, %s343_s30  ;;  %p347_p1 = scmp.lt.u32.totalorder %s343_s30, %s697_s1 }
   0x9   :  { %p349_p2 = pnand %p347_p1, %p344_p0 }
   0xb   :  { %352 = shalt.err (!%p349_p2)
}
   0xc   :  { %s353_s12 = scalar_lea.vmem %s36_s25, 128  ;;  %p358_p4 = scmp.lt.s32.totalorder %s36_s25, %s36_s25 }
   0xd   :  { %p354_p3 = scmp.ne.s32.totalorder %s36_s25, %s353_s12  ;;  %p359_p5 = scmp.lt.s32.totalorder %s353_s12, %s353_s12 }
   0xf   :  { %p360_p6 = por %p359_p5, %p358_p4 }
  0x11   :  { %p361_p7 = pnand %p360_p6, %p354_p3 }
  0x13   :  { %364 = shalt.err (!%p361_p7)
}
  0x14   :  { %s487_s13 = smov 64   ;;  %s488_s14 = smov 4  }
  0x15   :  { %41 = dma.hbm_to_vmem [thread:$0]  %s697_s1, 128, %s36_s25, [#allocation6], %s487_s13, %s487_s13, %s488_s14  }
  0x16   :  { %s365_s19 = scalar_lea.hbm %s696_s0, 128 }
  0x17   :  { %p366_p8 = scmp.ne.s32.totalorder %s696_s0, %s365_s19  ;;  %p369_p9 = scmp.lt.u32.totalorder %s365_s19, %s696_s0 }
  0x19   :  { %p371_p10 = pnand %p369_p9, %p366_p8 }
  0x1b   :  { %374 = shalt.err (!%p371_p10)
}
  0x1c   :  { %s375_s24 = scalar_lea.vmem %s535_s27, 128  ;;  %p380_p12 = scmp.lt.s32.totalorder %s535_s27, %s535_s27 }
  0x1d   :  { %p376_p11 = scmp.ne.s32.totalorder %s535_s27, %s375_s24  ;;  %p381_p13 = scmp.lt.s32.totalorder %s375_s24, %s375_s24 }
  0x1f   :  { %p382_p0 = por %p381_p13, %p380_p12 }
  0x21   :  { %p383_p1 = pnand %p382_p0, %p376_p11 }
  0x23   :  { %386 = shalt.err (!%p383_p1)
}
  0x24   :  { %29 = dma.hbm_to_vmem [thread:$0]  %s696_s0, 128, %s535_s27, [#allocation3], %s487_s13, %s487_s13, %s488_s14  }
  0x25   :  { %s489_s26 = smov [#allocation7]   ;;  %s387_s8 = scalar_lea.hbm %s700_s4, 512 }
  0x26   :  { %s51_s28 = sshll.u32 %s489_s26, 4  ;;  %p388_p2 = scmp.ne.s32.totalorder %s700_s4, %s387_s8  ;;  %s52_s28 = int_to_ptr.vmem [resolvable:$true] %s51_s28 }
  0x27   :  { %p391_p3 = scmp.lt.u32.totalorder %s387_s8, %s700_s4 }
  0x29   :  { %p393_p4 = pnand %p391_p3, %p388_p2 }
  0x2b   :  { %396 = shalt.err (!%p393_p4)
}
  0x2c   :  { %s397_s15 = scalar_lea.vmem %s52_s28, 512  ;;  %p402_p6 = scmp.lt.s32.totalorder %s52_s28, %s52_s28 }
  0x2d   :  { %p398_p5 = scmp.ne.s32.totalorder %s52_s28, %s397_s15  ;;  %p403_p7 = scmp.lt.s32.totalorder %s397_s15, %s397_s15 }
  0x2f   :  { %p404_p8 = por %p403_p7, %p402_p6 }
  0x31   :  { %p405_p9 = pnand %p404_p8, %p398_p5 }
  0x33   :  { %408 = shalt.err (!%p405_p9)
}
  0x34   :  { %s490_s0 = smov 128   ;;  %s491_s27 = smov 8  }
  0x35   :  { %57 = dma.hbm_to_vmem [thread:$0]  %s700_s4, 512, %s52_s28, [#allocation6], %s490_s0, %s490_s0, %s491_s27  }
  0x36   :  { %s492_s16 = smov [#allocation8]   ;;  %s409_s20 = scalar_lea.hbm %s701_s5, 512 }
  0x37   :  { %s63_s17 = sshll.u32 %s492_s16, 4  ;;  %p410_p10 = scmp.ne.s32.totalorder %s701_s5, %s409_s20  ;;  %s64_s17 = int_to_ptr.vmem [resolvable:$true] %s63_s17 }
  0x38   :  { %p413_p11 = scmp.lt.u32.totalorder %s409_s20, %s701_s5 }
  0x3a   :  { %p415_p12 = pnand %p413_p11, %p410_p10 }
  0x3c   :  { %418 = shalt.err (!%p415_p12)
}
  0x3d   :  { %s419_s1 = scalar_lea.vmem %s64_s17, 512  ;;  %p424_p0 = scmp.lt.s32.totalorder %s64_s17, %s64_s17 }
  0x3e   :  { %p420_p13 = scmp.ne.s32.totalorder %s64_s17, %s419_s1  ;;  %p425_p1 = scmp.lt.s32.totalorder %s419_s1, %s419_s1 }
  0x40   :  { %p426_p2 = por %p425_p1, %p424_p0 }
  0x42   :  { %p427_p3 = pnand %p426_p2, %p420_p13 }
  0x44   :  { %430 = shalt.err (!%p427_p3)
}
  0x45   :  { %69 = dma.hbm_to_vmem [thread:$0]  %s701_s5, 512, %s64_s17, [#allocation9], %s490_s0, %s490_s0, %s491_s27  }
  0x46   :  { %475 = dma.done.wait [#allocation3], 128  }
  0x47   :  { %476 = vsyncadd [#allocation3], 4294967168 }
  0x48   :  { %477 = dma.done.wait [#allocation6], 640  }
  0x49   :  { %478 = vsyncadd [#allocation6], 4294966656 }
  0x4a   :  { %479 = dma.done.wait [#allocation9], 512  }
  0x4b   :  { %480 = vsyncadd [#allocation9], 4294966784  ;;  %v128_v0 = vlaneseq  ;;  %v82_v2 = vld [vmem:[#allocation2] sm:$0xf]  ;;  %v84_v3 = vld [vmem:[#allocation5] sm:$0xf] }
  0x4c   :  { %v329_v4 = vld [vmem:[%s698_s2] ss:$0 sm:$0xff]  ;;  %v602_v12 = vld [vmem:[#allocation7] sm:$0xff]  ;;  %v83_v18 = vld [vmem:[#allocation2 + $0x4] sm:$0xf]  ;;  %vm272_vm0 = vcmask 261120  }
  0x4d   :  { %v129_v1 = vshrl.u32 %v128_v0, 7  ;;  %v331_v5 = vld [vmem:[%s699_s3] ss:$0 sm:$0xff]  ;;  %v102_v6 = vmul.f32 %v329_v4, %v82_v2  ;;  %v122_v7 = vmul.f32 %v329_v4, %v84_v3  ;;  %v604_v13 = vld [vmem:[#allocation8] sm:$0xff]  ;;  %v85_v19 = vld [vmem:[#allocation5 + $0x4] sm:$0xf] }
  0x4e   :  { %v116_v8 = vmul.f32 %v331_v5, %v84_v3  ;;  %v120_v9 = vmul.f32 %v331_v5, %v82_v2  ;;  %v330_v20 = vld [vmem:[%s698_s2 + $0x1] ss:$0 sm:$0xff]  ;;  %v611_v21 = vld [vmem:[#allocation7 + $0x8] sm:$0xff]  ;;  %v619_v31 = vld [vmem:[#allocation7 + $0x18] sm:$0xff]  ;;  %s494_s11 = smov [#allocation11]  }
  0x4f   :  { %v130_v10 = vsub.s32 0, %v129_v1  ;;  %v166_v11 = vsub.s32 1, %v129_v1  ;;  %v202_v14 = vsub.s32 2, %v129_v1  ;;  %v606_v15 = vsub.s32 3, %v129_v1  ;;  %v613_v22 = vld [vmem:[#allocation8 + $0x8] sm:$0xff]  ;;  %v615_v23 = vld [vmem:[#allocation7 + $0x10] sm:$0xff] }
  0x50   :  { %v118_v16 = vsub.f32 %v102_v6, %v116_v8  ;;  %v124_v17 = vadd.f32 %v122_v7, %v120_v9  ;;  %v103_v24 = vmul.f32 %v330_v20, %v83_v18  ;;  %v123_v25 = vmul.f32 %v330_v20, %v85_v19  ;;  %v617_v30 = vld [vmem:[#allocation8 + $0x10] sm:$0xff]  ;;  %v621_v32 = vld [vmem:[#allocation8 + $0x18] sm:$0xff]  ;;  %s311_s12 = sshll.u32 %s494_s11, 4  ;;  %s312_s12 = int_to_ptr.vmem [resolvable:$true] %s311_s12 }
  0x51   :  { %v332_v37 = vld [vmem:[%s699_s3 + $0x1] ss:$0 sm:$0xff]  ;;  %s493_s3 = smov [#allocation10]  }
  0x52   :  { %v131_v26 = vrot.slane %v118_v16, %v130_v10  ;;  %v141_v27 = vrot.slane %v124_v17, %v130_v10  ;;  %v167_v28 = vrot.slane %v118_v16, %v166_v11  ;;  %v177_v29 = vrot.slane %v124_v17, %v166_v11  ;;  %s299_s10 = sshll.u32 %s493_s3, 4  ;;  %s300_s10 = int_to_ptr.vmem [resolvable:$true] %s299_s10 }
  0x53   :  { %v203_v33 = vrot.slane %v118_v16, %v202_v14  ;;  %v213_v34 = vrot.slane %v124_v17, %v202_v14  ;;  %v239_v35 = vrot.slane %v118_v16, %v606_v15  ;;  %v249_v36 = vrot.slane %v124_v17, %v606_v15  ;;  %s431_s15 = scalar_lea.vmem %s300_s10, 256  ;;  %p436_p5 = scmp.lt.s32.totalorder %s300_s10, %s300_s10 }
  0x54   :  { %v136_v38 = vmul.f32 %v131_v26, %v602_v12  ;;  %v146_v39 = vmul.f32 %v141_v27, %v604_v13  ;;  %v172_v40 = vmul.f32 %v167_v28, %v611_v21  ;;  %v182_v41 = vmul.f32 %v177_v29, %v613_v22  ;;  %p432_p4 = scmp.ne.s32.totalorder %s300_s10, %s431_s15  ;;  %p437_p6 = scmp.lt.s32.totalorder %s431_s15, %s431_s15 }
  0x55   :  { %v208_v42 = vmul.f32 %v203_v33, %v615_v23  ;;  %v218_v43 = vmul.f32 %v213_v34, %v617_v30  ;;  %v244_v44 = vmul.f32 %v239_v35, %v619_v31  ;;  %v254_v45 = vmul.f32 %v249_v36, %v621_v32 }
  0x56   :  { %v148_v46 = vsub.f32 %v136_v38, %v146_v39  ;;  %v184_v47 = vsub.f32 %v172_v40, %v182_v41  ;;  %v117_v48 = vmul.f32 %v332_v37, %v85_v19  ;;  %v121_v49 = vmul.f32 %v332_v37, %v83_v18  ;;  %p438_p7 = por %p437_p6, %p436_p5 }
  0x57   :  { %v220_v50 = vsub.f32 %v208_v42, %v218_v43  ;;  %v256_v51 = vsub.f32 %v244_v44, %v254_v45  ;;  %v152_v52 = vmul.f32 %v131_v26, %v604_v13  ;;  %v154_v53 = vmul.f32 %v141_v27, %v602_v12 }
  0x58   :  { %v186_v54 = vadd.f32 %v184_v47, %v148_v46  ;;  %v119_v55 = vsub.f32 %v103_v24, %v117_v48  ;;  %v125_v56 = vadd.f32 %v123_v25, %v121_v49  ;;  %v188_v57 = vmul.f32 %v167_v28, %v613_v22  ;;  %p439_p8 = pnand %p438_p7, %p432_p4 }
  0x59   :  { %v156_v58 = vadd.f32 %v154_v53, %v152_v52  ;;  %v190_v59 = vmul.f32 %v177_v29, %v611_v21  ;;  %v224_v60 = vmul.f32 %v203_v33, %v617_v30  ;;  %v226_v61 = vmul.f32 %v213_v34, %v615_v23 }
  0x5a   :  { %v222_v62 = vadd.f32 %v220_v50, %v186_v54  ;;  %v135_v63 = vrot.slane %v119_v55, %v130_v10  ;;  %v145_v0 = vrot.slane %v125_v56, %v130_v10  ;;  %v171_v1 = vrot.slane %v119_v55, %v166_v11 }
  0x5b   :  { %v181_v2 = vrot.slane %v125_v56, %v166_v11  ;;  %v207_v3 = vrot.slane %v119_v55, %v202_v14  ;;  %v217_v4 = vrot.slane %v125_v56, %v202_v14  ;;  %v243_v5 = vrot.slane %v119_v55, %v606_v15 }
  0x5c   :  { %v258_v6 = vadd.f32 %v256_v51, %v222_v62  ;;  %v137_v7 = vmul.f32 %v135_v63, %v602_v12  ;;  %v147_v8 = vmul.f32 %v145_v0, %v604_v13  ;;  %v173_v9 = vmul.f32 %v171_v1, %v611_v21 }
  0x5d   :  { %v183_v16 = vmul.f32 %v181_v2, %v613_v22  ;;  %v209_v17 = vmul.f32 %v207_v3, %v615_v23  ;;  %v219_v18 = vmul.f32 %v217_v4, %v617_v30  ;;  %v245_v10 = vmul.f32 %v243_v5, %v619_v31 }
  0x5e   :  { %273 = vst.msk [vmem:[#allocation10] sm:$0xff] %vm272_vm0, %v258_v6  ;;  %v149_v11 = vsub.f32 %v137_v7, %v147_v8  ;;  %v253_v14 = vrot.slane %v125_v56, %v606_v15  ;;  %v192_v19 = vadd.f32 %v190_v59, %v188_v57  ;;  %v228_v20 = vadd.f32 %v226_v61, %v224_v60 }
  0x5f   :  { %v185_v24 = vsub.f32 %v173_v9, %v183_v16  ;;  %v221_v25 = vsub.f32 %v209_v17, %v219_v18  ;;  %v260_v26 = vmul.f32 %v239_v35, %v621_v32  ;;  %v262_v27 = vmul.f32 %v249_v36, %v619_v31 }
  0x60   :  { %v255_v28 = vmul.f32 %v253_v14, %v621_v32  ;;  %v194_v29 = vadd.f32 %v192_v19, %v156_v58  ;;  %v153_v33 = vmul.f32 %v135_v63, %v604_v13  ;;  %v155_v34 = vmul.f32 %v145_v0, %v602_v12 }
  0x61   :  { %v187_v37 = vadd.f32 %v185_v24, %v149_v11  ;;  %v264_v38 = vadd.f32 %v262_v27, %v260_v26  ;;  %v189_v39 = vmul.f32 %v171_v1, %v613_v22  ;;  %v191_v15 = vmul.f32 %v181_v2, %v611_v21 }
  0x62   :  { %v257_v40 = vsub.f32 %v245_v10, %v255_v28  ;;  %v230_v41 = vadd.f32 %v228_v20, %v194_v29  ;;  %v157_v42 = vadd.f32 %v155_v34, %v153_v33  ;;  %v225_v35 = vmul.f32 %v207_v3, %v617_v30 }
  0x63   :  { %v223_v36 = vadd.f32 %v221_v25, %v187_v37  ;;  %v193_v43 = vadd.f32 %v191_v15, %v189_v39  ;;  %v227_v44 = vmul.f32 %v217_v4, %v615_v23  ;;  %v261_v13 = vmul.f32 %v243_v5, %v621_v32 }
  0x64   :  { %v266_v12 = vadd.f32 %v264_v38, %v230_v41  ;;  %v263_v45 = vmul.f32 %v253_v14, %v619_v31 }
  0x65   :  { %v259_v46 = vadd.f32 %v257_v40, %v223_v36  ;;  %v195_v22 = vadd.f32 %v193_v43, %v157_v42  ;;  %v229_v47 = vadd.f32 %v227_v44, %v225_v35 }
  0x66   :  { %275 = vst.msk [vmem:[#allocation11] sm:$0xff] %vm272_vm0, %v266_v12  ;;  %v265_v21 = vadd.f32 %v263_v45, %v261_v13 }
  0x67   :  { %274 = vst.msk [vmem:[#allocation10 + $0x8] sm:$0xff] %vm272_vm0, %v259_v46  ;;  %v231_v30 = vadd.f32 %v229_v47, %v195_v22 }
  0x68   :  { %442 = shalt.err (!%p439_p8)
}
  0x69   :  { %s443_s16 = scalar_lea.hbm %s702_s6, 256 }
  0x6a   :  { %p444_p9 = scmp.ne.s32.totalorder %s702_s6, %s443_s16  ;;  %p447_p10 = scmp.lt.u32.totalorder %s443_s16, %s702_s6 }
  0x6c   :  { %p449_p11 = pnand %p447_p10, %p444_p9 }
  0x6e   :  { %452 = shalt.err (!%p449_p11)
}
  0x6f   :  { %305 = dma.vmem_to_hbm [thread:$0]  %s300_s10, 256, %s702_s6, [#allocation4], %s490_s0, %s490_s0, %s491_s27   ;;  %v267_v23 = vadd.f32 %v265_v21, %v231_v30 }
  0x70   :  { %s453_s23 = scalar_lea.vmem %s312_s12, 256  ;;  %p458_p13 = scmp.lt.s32.totalorder %s312_s12, %s312_s12 }
  0x71   :  { %276 = vst.msk [vmem:[#allocation11 + $0x8] sm:$0xff] %vm272_vm0, %v267_v23  ;;  %p454_p12 = scmp.ne.s32.totalorder %s312_s12, %s453_s23  ;;  %p459_p0 = scmp.lt.s32.totalorder %s453_s23, %s453_s23 }
  0x73   :  { %p460_p1 = por %p459_p0, %p458_p13 }
  0x75   :  { %p461_p2 = pnand %p460_p1, %p454_p12 }
  0x77   :  { %464 = shalt.err (!%p461_p2)
}
  0x78   :  { %s465_s4 = scalar_lea.hbm %s703_s7, 256 }
  0x79   :  { %p466_p3 = scmp.ne.s32.totalorder %s703_s7, %s465_s4  ;;  %p469_p4 = scmp.lt.u32.totalorder %s465_s4, %s703_s7 }
  0x7b   :  { %p471_p5 = pnand %p469_p4, %p466_p3 }
  0x7d   :  { %474 = shalt.err (!%p471_p5)
}
  0x7e   :  { %317 = dma.vmem_to_hbm [thread:$0]  %s312_s12, 256, %s703_s7, [#allocation12], %s490_s0, %s490_s0, %s491_s27  }
  0x7f   :  { %481 = dma.done.wait [#allocation4], 256  }
  0x80   :  { %482 = vsyncadd [#allocation4], 4294967040 }
  0x81   :  { %483 = dma.done.wait [#allocation12], 256  }
  0x82   :  { %484 = vsyncadd [#allocation12], 4294967040 }
  0x83   :  { %324 = vsyncpa [#allocation3], 1 }
  0x84   :  { %325 = vsyncpa [#allocation6], 1 }
  0x85   :  { %326 = vsyncpa [#allocation9], 1 }
  0x86   :  { %327 = vsyncpa [#allocation4], 1 }
  0x87   :  { %328 = vsyncpa [#allocation12], 1 }

</bundles_post_ra>
